<compile_context>
chip_gen: v7x
topology: tpu7x:2x2x1
jax: 0.10.0
libtpu: 0.0.40
codegen_flags: <defaults>
</compile_context>

<pallas_src>
import functools

import jax
import jax.numpy as jnp
from jax.experimental import pallas as pl
from jax.experimental.pallas import tpu as pltpu


@functools.lru_cache(maxsize=1)
def _device_cfg():
    kind = jax.devices()[0].device_kind.lower()
    if ("v5" in kind) or ("v6" in kind):
        max_tile, vmem_limit = 8192, 64 * 1024 * 1024   # 128 MiB physical VMEM
    else:                                               # v7x / unknown: conservative
        max_tile, vmem_limit = 4096, 32 * 1024 * 1024
    use_bf16_ew = ("v6" in kind) or ("v7" in kind)       # bf16 VPU available
    return max_tile, vmem_limit, use_bf16_ew


def _make_kernel(tile_n, n_valid, needs_mask, use_bf16_ew):
    ew = jnp.bfloat16 if use_bf16_ew else jnp.float32

    def mm(x, w_ref):
        # bf16 operands, f32 MXU accumulation (MXU-native on v5e/v6e/v7x)
        return jnp.dot(x.astype(jnp.bfloat16), w_ref[...],
                       preferred_element_type=jnp.float32)

    def kernel(pts_ref,
               w1, b1, w2, b2,                 # PNet2D : 2 -> 64 -> 128
               w3, b3, w4, b4, w5, b5,         # PNetkD : 128 -> 128 -> 128 -> 128
               out_ref):                       # (1, 1, 128) per-tile max
        pts = pts_ref[...]                                         # (T, 8) f32
        # layer 1 on the MXU (w1 zero-padded to (8, 64) in the wrapper)
        h = jnp.dot(pts, w1[...], preferred_element_type=jnp.float32)
        h = jnp.maximum(h.astype(ew) + b1[...], 0)                 # (T, 64)
        h = jnp.maximum(mm(h, w2).astype(ew) + b2[...], 0)         # (T, 128)
        g = jnp.maximum(mm(h, w3).astype(ew) + b3[...], 0)
        g = jnp.maximum(mm(g, w4).astype(ew) + b4[...], 0)
        g = mm(g, w5) + b5[...]                                    # (T, 128) f32

        if needs_mask:
            rows = jax.lax.broadcasted_iota(jnp.int32, g.shape, 0)
            valid = (pl.program_id(0) * tile_n + rows) < n_valid
            g = jnp.where(valid, g, -jnp.inf)                      # mask pad rows

        out_ref[...] = jnp.max(g, axis=0, keepdims=True).reshape(1, 1, 128)

    return kernel


def _full_spec(a):
    # whole-array block, constant index map (resident across all grid steps)
    assert a.ndim == 2
    return pl.BlockSpec(a.shape, lambda i: (0, 0))


@jax.jit
def festimator(x, f, params):
    (w1, b1, w2, b2, w3, b3, w4, b4, w5, b5,
     wfc1, bfc1, wfc2, bfc2, wfc3, bfc3) = params
    n = x.shape[0]
    max_tile, vmem_limit, use_bf16_ew = _device_cfg()

    tile_n = max_tile if n >= max_tile else max(8, ((n + 7) // 8) * 8)
    n_pad = pl.cdiv(n, tile_n) * tile_n
    num_tiles = n_pad // tile_n
    needs_mask = (n_pad != n)

    # points padded to (n_pad, 8): rows >= n are zero (masked to -inf in-kernel
    # before the max-pool), channels 2..7 are zero so layer 1 is a plain MXU dot.
    x8 = jnp.pad(x, ((0, n_pad - n), (0, 8 - x.shape[1])))
    w1p = jnp.pad(w1, ((0, 8 - w1.shape[0]), (0, 0)))               # (8, 64) f32

    ew = jnp.bfloat16 if use_bf16_ew else jnp.float32
    consts = (w1p, b1.astype(ew),
              w2.astype(jnp.bfloat16), b2.astype(ew),
              w3.astype(jnp.bfloat16), b3.astype(ew),
              w4.astype(jnp.bfloat16), b4.astype(ew),
              w5.astype(jnp.bfloat16), b5)                          # b5 stays f32

    kernel = _make_kernel(tile_n, n, needs_mask, use_bf16_ew)

    const_bytes = sum(int(a.size) * a.dtype.itemsize for a in consts)
    flops = 2 * n_pad * (8 * 64 + 64 * 128 + 3 * 128 * 128)
    cost = pl.CostEstimate(
        flops=flops, transcendentals=0,
        bytes_accessed=int(x8.size) * 4 + const_bytes + num_tiles * 128 * 4)

    partials = pl.pallas_call(
        kernel,
        out_shape=jax.ShapeDtypeStruct((num_tiles, 1, 128), jnp.float32),
        grid_spec=pltpu.PrefetchScalarGridSpec(
            num_scalar_prefetch=0,
            grid=(num_tiles,),
            in_specs=([pl.BlockSpec((tile_n, 8), lambda i: (i, 0))]
                      + [_full_spec(a) for a in consts]),
            out_specs=pl.BlockSpec((1, 1, 128), lambda i: (i, 0, 0)),
        ),
        compiler_params=pltpu.CompilerParams(
            dimension_semantics=("parallel",),   # tiles are independent partial maxes
            vmem_limit_bytes=vmem_limit,
        ),
        cost_estimate=cost,
    )(x8, *consts)

    # global max-pool over tiles + tiny fc head (129->128->128->1) in f32 XLA.
    feat = jnp.max(partials[:, 0, :], axis=0, keepdims=True)        # (1, 128)
    z = jnp.concatenate([feat, f], axis=1)                          # (1, 129)
    z = jnp.maximum(z @ wfc1 + bfc1, 0.0)
    z = jnp.maximum(z @ wfc2 + bfc2, 0.0)
    return jax.nn.sigmoid(z @ wfc3 + bfc3)                          # (1, 1)


def reference(x, f, params):
    # pure-f32 reference of FEstimator.forward
    (w1, b1, w2, b2, w3, b3, w4, b4, w5, b5,
     wfc1, bfc1, wfc2, bfc2, wfc3, bfc3) = params
    h = jnp.maximum(x @ w1 + b1, 0.0)
    h = jnp.maximum(h @ w2 + b2, 0.0)
    g = jnp.maximum(h @ w3 + b3, 0.0)
    g = jnp.maximum(g @ w4 + b4, 0.0)
    g = g @ w5 + b5
    feat = jnp.max(g, axis=0, keepdims=True)             # (1, 128) global feature
    z = jnp.concatenate([feat, f], axis=1)                # (1, 129)
    z = jnp.maximum(z @ wfc1 + bfc1, 0.0)
    z = jnp.maximum(z @ wfc2 + bfc2, 0.0)
    return jax.nn.sigmoid(z @ wfc3 + bfc3)


def init_params(key):
    # deterministic synthetic weights; (in, out) layout, biases as (1, out)
    shapes = [
        ((2, 64), (1, 64)),        # PNet2D conv1
        ((64, 128), (1, 128)),     # PNet2D conv2
        ((128, 128), (1, 128)),    # PNetkD conv1
        ((128, 128), (1, 128)),    # PNetkD conv2
        ((128, 128), (1, 128)),    # PNetkD conv3
        ((129, 128), (1, 128)),    # fc1
        ((128, 128), (1, 128)),    # fc2
        ((128, 1), (1, 1)),        # fc3
    ]
    params = []
    keys = jax.random.split(key, 2 * len(shapes))
    for idx, (ws, bs) in enumerate(shapes):
        w = 0.1 * jax.random.normal(keys[2 * idx], ws, dtype=jnp.float32)
        b = 0.1 * jax.random.normal(keys[2 * idx + 1], bs, dtype=jnp.float32)
        params += [w, b]
    return tuple(params)


if __name__ == "__main__":
    key = jax.random.PRNGKey(0)
    kx, kf, kp = jax.random.split(key, 3)

    params = init_params(kp)
    f = jax.random.normal(kf, (1, 1), dtype=jnp.float32)

    # single-tile (256), padded+masked non-multiple (1001), multi-tile (16384)
    for N in (256, 1001, 16384):
        x = jax.random.normal(jax.random.fold_in(kx, N), (N, 2), dtype=jnp.float32)
        out = jax.block_until_ready(festimator(x, f, params))
        ref = reference(x, f, params)
        assert out.shape == (1, 1)
        # bf16 matmul operands in the kernel vs. f32 reference -> loose tolerance
        assert jnp.allclose(out, ref, rtol=5e-2, atol=5e-2), (N, out, ref)

    print("KERNEL_OK")
</pallas_src>

<mosaic_0001>
module attributes {stable_mosaic.version = 11 : i64} {
  func.func @kernel(%arg0: i32, %arg1: memref<256x8xf32, #tpu.memory_space<vmem>>, %arg2: memref<8x64xf32, #tpu.memory_space<vmem>>, %arg3: memref<1x64xf32, #tpu.memory_space<vmem>>, %arg4: memref<64x128xbf16, #tpu.memory_space<vmem>>, %arg5: memref<1x128xf32, #tpu.memory_space<vmem>>, %arg6: memref<128x128xbf16, #tpu.memory_space<vmem>>, %arg7: memref<1x128xf32, #tpu.memory_space<vmem>>, %arg8: memref<128x128xbf16, #tpu.memory_space<vmem>>, %arg9: memref<1x128xf32, #tpu.memory_space<vmem>>, %arg10: memref<128x128xbf16, #tpu.memory_space<vmem>>, %arg11: memref<1x128xf32, #tpu.memory_space<vmem>>, %arg12: memref<1x1x128xf32, #tpu.memory_space<vmem>>) attributes {dimension_semantics = [#tpu.dimension_semantics<parallel>], iteration_bounds = array<i64: 1>, scalar_prefetch = 0 : i64, scratch_operands = 0 : i64, tpu.core_type = #tpu.core_type<tc>, window_params = [{transform_indices = @transform_0, window_bounds = array<i64: 256, 8>}, {pipeline_mode = #tpu.pipeline_mode<synchronous>, transform_indices = @transform_1, window_bounds = array<i64: 8, 64>}, {pipeline_mode = #tpu.pipeline_mode<synchronous>, transform_indices = @transform_2, window_bounds = array<i64: 1, 64>}, {pipeline_mode = #tpu.pipeline_mode<synchronous>, transform_indices = @transform_3, window_bounds = array<i64: 64, 128>}, {pipeline_mode = #tpu.pipeline_mode<synchronous>, transform_indices = @transform_4, window_bounds = array<i64: 1, 128>}, {pipeline_mode = #tpu.pipeline_mode<synchronous>, transform_indices = @transform_5, window_bounds = array<i64: 128, 128>}, {pipeline_mode = #tpu.pipeline_mode<synchronous>, transform_indices = @transform_6, window_bounds = array<i64: 1, 128>}, {pipeline_mode = #tpu.pipeline_mode<synchronous>, transform_indices = @transform_7, window_bounds = array<i64: 128, 128>}, {pipeline_mode = #tpu.pipeline_mode<synchronous>, transform_indices = @transform_8, window_bounds = array<i64: 1, 128>}, {pipeline_mode = #tpu.pipeline_mode<synchronous>, transform_indices = @transform_9, window_bounds = array<i64: 128, 128>}, {pipeline_mode = #tpu.pipeline_mode<synchronous>, transform_indices = @transform_10, window_bounds = array<i64: 1, 128>}, {transform_indices = @transform_11, window_bounds = array<i64: 1, 1, 128>}]} {
    %c0 = arith.constant 0 : index
    %c0_0 = arith.constant 0 : index
    %0 = vector.load %arg1[%c0, %c0_0] : memref<256x8xf32, #tpu.memory_space<vmem>>, vector<256x8xf32>
    %c0_1 = arith.constant 0 : index
    %c0_2 = arith.constant 0 : index
    %1 = vector.load %arg2[%c0_1, %c0_2] : memref<8x64xf32, #tpu.memory_space<vmem>>, vector<8x64xf32>
    %cst = arith.constant dense<0.000000e+00> : vector<256x64xf32>
    %2 = tpu.matmul %0, %1, %cst {dimension_numbers = #tpu.dot_dimension_numbers<[1], [0], [0], [1], [0, 0, 1, 1], [], []>} : vector<256x8xf32>, vector<8x64xf32>, vector<256x64xf32> -> vector<256x64xf32>
    %c0_3 = arith.constant 0 : index
    %c0_4 = arith.constant 0 : index
    %3 = vector.load %arg3[%c0_3, %c0_4] : memref<1x64xf32, #tpu.memory_space<vmem>>, vector<1x64xf32>
    %4 = vector.broadcast %3 : vector<1x64xf32> to vector<256x64xf32>
    %5 = arith.addf %2, %4 : vector<256x64xf32>
    %cst_5 = arith.constant 0.000000e+00 : f32
    %6 = vector.broadcast %cst_5 : f32 to vector<256x64xf32>
    %7 = arith.maximumf %5, %6 : vector<256x64xf32>
    %8 = arith.truncf %7 : vector<256x64xf32> to vector<256x64xbf16>
    %c0_6 = arith.constant 0 : index
    %c0_7 = arith.constant 0 : index
    %9 = vector.load %arg4[%c0_6, %c0_7] : memref<64x128xbf16, #tpu.memory_space<vmem>>, vector<64x128xbf16>
    %cst_8 = arith.constant dense<0.000000e+00> : vector<256x128xf32>
    %10 = tpu.matmul %8, %9, %cst_8 {dimension_numbers = #tpu.dot_dimension_numbers<[1], [0], [0], [1], [0, 0, 1, 1], [], []>} : vector<256x64xbf16>, vector<64x128xbf16>, vector<256x128xf32> -> vector<256x128xf32>
    %c0_9 = arith.constant 0 : index
    %c0_10 = arith.constant 0 : index
    %11 = vector.load %arg5[%c0_9, %c0_10] : memref<1x128xf32, #tpu.memory_space<vmem>>, vector<1x128xf32>
    %12 = vector.broadcast %11 : vector<1x128xf32> to vector<256x128xf32>
    %13 = arith.addf %10, %12 : vector<256x128xf32>
    %cst_11 = arith.constant 0.000000e+00 : f32
    %14 = vector.broadcast %cst_11 : f32 to vector<256x128xf32>
    %15 = arith.maximumf %13, %14 : vector<256x128xf32>
    %16 = arith.truncf %15 : vector<256x128xf32> to vector<256x128xbf16>
    %c0_12 = arith.constant 0 : index
    %c0_13 = arith.constant 0 : index
    %17 = vector.load %arg6[%c0_12, %c0_13] : memref<128x128xbf16, #tpu.memory_space<vmem>>, vector<128x128xbf16>
    %cst_14 = arith.constant dense<0.000000e+00> : vector<256x128xf32>
    %18 = tpu.matmul %16, %17, %cst_14 {dimension_numbers = #tpu.dot_dimension_numbers<[1], [0], [0], [1], [0, 0, 1, 1], [], []>} : vector<256x128xbf16>, vector<128x128xbf16>, vector<256x128xf32> -> vector<256x128xf32>
    %c0_15 = arith.constant 0 : index
    %c0_16 = arith.constant 0 : index
    %19 = vector.load %arg7[%c0_15, %c0_16] : memref<1x128xf32, #tpu.memory_space<vmem>>, vector<1x128xf32>
    %20 = vector.broadcast %19 : vector<1x128xf32> to vector<256x128xf32>
    %21 = arith.addf %18, %20 : vector<256x128xf32>
    %cst_17 = arith.constant 0.000000e+00 : f32
    %22 = vector.broadcast %cst_17 : f32 to vector<256x128xf32>
    %23 = arith.maximumf %21, %22 : vector<256x128xf32>
    %24 = arith.truncf %23 : vector<256x128xf32> to vector<256x128xbf16>
    %c0_18 = arith.constant 0 : index
    %c0_19 = arith.constant 0 : index
    %25 = vector.load %arg8[%c0_18, %c0_19] : memref<128x128xbf16, #tpu.memory_space<vmem>>, vector<128x128xbf16>
    %cst_20 = arith.constant dense<0.000000e+00> : vector<256x128xf32>
    %26 = tpu.matmul %24, %25, %cst_20 {dimension_numbers = #tpu.dot_dimension_numbers<[1], [0], [0], [1], [0, 0, 1, 1], [], []>} : vector<256x128xbf16>, vector<128x128xbf16>, vector<256x128xf32> -> vector<256x128xf32>
    %c0_21 = arith.constant 0 : index
    %c0_22 = arith.constant 0 : index
    %27 = vector.load %arg9[%c0_21, %c0_22] : memref<1x128xf32, #tpu.memory_space<vmem>>, vector<1x128xf32>
    %28 = vector.broadcast %27 : vector<1x128xf32> to vector<256x128xf32>
    %29 = arith.addf %26, %28 : vector<256x128xf32>
    %cst_23 = arith.constant 0.000000e+00 : f32
    %30 = vector.broadcast %cst_23 : f32 to vector<256x128xf32>
    %31 = arith.maximumf %29, %30 : vector<256x128xf32>
    %32 = arith.truncf %31 : vector<256x128xf32> to vector<256x128xbf16>
    %c0_24 = arith.constant 0 : index
    %c0_25 = arith.constant 0 : index
    %33 = vector.load %arg10[%c0_24, %c0_25] : memref<128x128xbf16, #tpu.memory_space<vmem>>, vector<128x128xbf16>
    %cst_26 = arith.constant dense<0.000000e+00> : vector<256x128xf32>
    %34 = tpu.matmul %32, %33, %cst_26 {dimension_numbers = #tpu.dot_dimension_numbers<[1], [0], [0], [1], [0, 0, 1, 1], [], []>} : vector<256x128xbf16>, vector<128x128xbf16>, vector<256x128xf32> -> vector<256x128xf32>
    %c0_27 = arith.constant 0 : index
    %c0_28 = arith.constant 0 : index
    %35 = vector.load %arg11[%c0_27, %c0_28] : memref<1x128xf32, #tpu.memory_space<vmem>>, vector<1x128xf32>
    %36 = vector.broadcast %35 : vector<1x128xf32> to vector<256x128xf32>
    %37 = arith.addf %34, %36 : vector<256x128xf32>
    %cst_29 = arith.constant dense<0xFF800000> : vector<128xf32>
    %38 = vector.multi_reduction <maximumf>, %37, %cst_29 [0] : vector<256x128xf32> to vector<128xf32>
    %39 = vector.shape_cast %38 : vector<128xf32> to vector<1x128xf32>
    %40 = vector.shape_cast %39 : vector<1x128xf32> to vector<1x1x128xf32>
    %c0_30 = arith.constant 0 : index
    %c0_31 = arith.constant 0 : index
    %c0_32 = arith.constant 0 : index
    %41 = vector.load %arg12[%c0_30, %c0_31, %c0_32] : memref<1x1x128xf32, #tpu.memory_space<vmem>>, vector<1x1x128xf32>
    tpu.vector_store %arg12[%c0_30, %c0_31, %c0_32], %40 {strides = array<i32>} : memref<1x1x128xf32, #tpu.memory_space<vmem>>, vector<1x1x128xf32>,
    return
  }
  func.func @transform_0(%arg0: i32) -> (i32, i32) {
    %c0_i32 = arith.constant 0 : i32
    %c0_i32_0 = arith.constant 0 : i32
    return %arg0, %c0_i32 : i32, i32
  }
  func.func @transform_1(%arg0: i32) -> (i32, i32) {
    %c0_i32 = arith.constant 0 : i32
    %c0_i32_0 = arith.constant 0 : i32
    %c0_i32_1 = arith.constant 0 : i32
    return %c0_i32, %c0_i32_0 : i32, i32
  }
  func.func @transform_2(%arg0: i32) -> (i32, i32) {
    %c0_i32 = arith.constant 0 : i32
    %c0_i32_0 = arith.constant 0 : i32
    %c0_i32_1 = arith.constant 0 : i32
    return %c0_i32, %c0_i32_0 : i32, i32
  }
  func.func @transform_3(%arg0: i32) -> (i32, i32) {
    %c0_i32 = arith.constant 0 : i32
    %c0_i32_0 = arith.constant 0 : i32
    %c0_i32_1 = arith.constant 0 : i32
    return %c0_i32, %c0_i32_0 : i32, i32
  }
  func.func @transform_4(%arg0: i32) -> (i32, i32) {
    %c0_i32 = arith.constant 0 : i32
    %c0_i32_0 = arith.constant 0 : i32
    %c0_i32_1 = arith.constant 0 : i32
    return %c0_i32, %c0_i32_0 : i32, i32
  }
  func.func @transform_5(%arg0: i32) -> (i32, i32) {
    %c0_i32 = arith.constant 0 : i32
    %c0_i32_0 = arith.constant 0 : i32
    %c0_i32_1 = arith.constant 0 : i32
    return %c0_i32, %c0_i32_0 : i32, i32
  }
  func.func @transform_6(%arg0: i32) -> (i32, i32) {
    %c0_i32 = arith.constant 0 : i32
    %c0_i32_0 = arith.constant 0 : i32
    %c0_i32_1 = arith.constant 0 : i32
    return %c0_i32, %c0_i32_0 : i32, i32
  }
  func.func @transform_7(%arg0: i32) -> (i32, i32) {
    %c0_i32 = arith.constant 0 : i32
    %c0_i32_0 = arith.constant 0 : i32
    %c0_i32_1 = arith.constant 0 : i32
    return %c0_i32, %c0_i32_0 : i32, i32
  }
  func.func @transform_8(%arg0: i32) -> (i32, i32) {
    %c0_i32 = arith.constant 0 : i32
    %c0_i32_0 = arith.constant 0 : i32
    %c0_i32_1 = arith.constant 0 : i32
    return %c0_i32, %c0_i32_0 : i32, i32
  }
  func.func @transform_9(%arg0: i32) -> (i32, i32) {
    %c0_i32 = arith.constant 0 : i32
    %c0_i32_0 = arith.constant 0 : i32
    %c0_i32_1 = arith.constant 0 : i32
    return %c0_i32, %c0_i32_0 : i32, i32
  }
  func.func @transform_10(%arg0: i32) -> (i32, i32) {
    %c0_i32 = arith.constant 0 : i32
    %c0_i32_0 = arith.constant 0 : i32
    %c0_i32_1 = arith.constant 0 : i32
    return %c0_i32, %c0_i32_0 : i32, i32
  }
  func.func @transform_11(%arg0: i32) -> (i32, i32, i32) {
    %c0_i32 = arith.constant 0 : i32
    %c0_i32_0 = arith.constant 0 : i32
    %c0_i32_1 = arith.constant 0 : i32
    return %arg0, %c0_i32, %c0_i32_0 : i32, i32, i32
  }
}

</mosaic_0001>

<bundles_post_ra>
// kernel: festimator.1
= control target key start
LH: loop header
LB: loop body
LE: loop exit
PB: predicated region body
PF: predicated region fallthrough
CT: control target
= control target key end

     0   :  { %vm79_vm0 = vcmask 64512   ;;  %vm488_vm1 = vcmask 523264   ;;  %s2538_s1 = inlined_call_operand.vmem [shape: f32[8,64], index: 1, kind: input, shape index: {}]   ;;  %s2539_s0 = inlined_call_operand.vmem [shape: f32[256,8], index: 0, kind: input, shape index: {}]   ;;  %s2540_s3 = inlined_call_operand.vmem [shape: bf16[64,128], index: 3, kind: input, shape index: {}]   ;;  %s2541_s5 = inlined_call_operand.vmem [shape: bf16[128,128], index: 5, kind: input, shape index: {}]   ;;  %s2542_s2 = inlined_call_operand.vmem [shape: f32[1,64], index: 2, kind: input, shape index: {}]   ;;  %s2543_s7 = inlined_call_operand.vmem [shape: bf16[128,128], index: 7, kind: input, shape index: {}]   ;;  %s2544_s4 = inlined_call_operand.vmem [shape: f32[1,128], index: 4, kind: input, shape index: {}]   ;;  %s2545_s9 = inlined_call_operand.vmem [shape: bf16[128,128], index: 9, kind: input, shape index: {}]   ;;  %s2546_s6 = inlined_call_operand.vmem [shape: f32[1,128], index: 6, kind: input, shape index: {}]   ;;  %s2547_s8 = inlined_call_operand.vmem [shape: f32[1,128], index: 8, kind: input, shape index: {}]   ;;  %s2548_s10 = inlined_call_operand.vmem [shape: f32[1,128], index: 10, kind: input, shape index: {}]   ;;  %s2549_s11 = inlined_call_operand.vmem [shape: f32[1,1,128], index: 11, kind: output, shape index: {}]  }
   0x1   :  { %v71_v0 = vld [vmem:[%s2538_s1] sm:$0xff]  ;;  %v40_v2 = vld [vmem:[%s2539_s0 + $0x8] sm:$0xff]  ;;  %v41_v3 = vld [vmem:[%s2539_s0 + $0x10] sm:$0xff] }
   0x2   :  { %v39_v1 = vld [vmem:[%s2539_s0] sm:$0xff]  ;;  %1786 = vmatprep.subr.mxu0 %v71_v0  ;;  %2020 = vmatprep.subr.mxu1 %v71_v0  ;;  %v42_v4 = vld [vmem:[%s2539_s0 + $0x18] sm:$0xff]  ;;  %v56_v7 = vld [vmem:[%s2539_s0 + $0x88] sm:$0xff] }
   0x3   :  { %1788 = vmatprep.mubr.msk.f32.mxu0 %vm79_vm0, %v39_v1  ;;  %1787 = vmatpush3.msra.mxu0 %v71_v0  ;;  %v43_v5 = vld [vmem:[%s2539_s0 + $0x20] sm:$0xff]  ;;  %v57_v8 = vld [vmem:[%s2539_s0 + $0x90] sm:$0xff]  ;;  %v44_v9 = vld [vmem:[%s2539_s0 + $0x28] sm:$0xff] }
   0x4   :  { %1789 = vmatmul.mubr.msk.f32.vlgmr.msra.gmra.mrb[0].mxu0 %vm79_vm0, %v40_v2  ;;  %2021 = vmatpush3.msra.mxu1 %v71_v0  ;;  %v55_v6 = vld [vmem:[%s2539_s0 + $0x80] sm:$0xff]  ;;  %v58_v10 = vld [vmem:[%s2539_s0 + $0x98] sm:$0xff]  ;;  %v45_v11 = vld [vmem:[%s2539_s0 + $0x30] sm:$0xff] }
   0x5   :  { %1791 = vmatprep.mubr.msk.f32.mxu0 %vm79_vm0, %v41_v3  ;;  %1812 = vmatprep.mubr.msk.f32.mxu1 %vm79_vm0, %v55_v6  ;;  %v59_v12 = vld [vmem:[%s2539_s0 + $0xa0] sm:$0xff]  ;;  %v46_v13 = vld [vmem:[%s2539_s0 + $0x38] sm:$0xff]  ;;  %v60_v14 = vld [vmem:[%s2539_s0 + $0xa8] sm:$0xff] }
   0x6   :  { %1813 = vmatmul.mubr.msk.f32.vlgmr.msra.gmra.mrb[0].mxu1 %vm79_vm0, %v56_v7  ;;  %v47_v15 = vld [vmem:[%s2539_s0 + $0x40] sm:$0xff]  ;;  %v61_v17 = vld [vmem:[%s2539_s0 + $0xb0] sm:$0xff]  ;;  %v2023_v18 = vld [vmem:[%s2540_s3 + $0x8] sm:$0xff]  }
   0x7   :  { %1815 = vmatprep.mubr.msk.f32.mxu1 %vm79_vm0, %v57_v8  ;;  %v2022_v16 = vld [vmem:[%s2540_s3] sm:$0xff]   ;;  %v48_v19 = vld [vmem:[%s2539_s0 + $0x48] sm:$0xff]  ;;  %v62_v20 = vld [vmem:[%s2539_s0 + $0xb8] sm:$0xff] }
   0x8   :  { %1792 = vmatmul.mubr.msk.f32.gmra.mrb[2].mxu0 %vm79_vm0, %v42_v4  ;;  %1836 = vmatprep.subr.bf16.mxu1 %v2022_v16  ;;  %v49_v21 = vld [vmem:[%s2539_s0 + $0x50] sm:$0xff]  ;;  %v63_v22 = vld [vmem:[%s2539_s0 + $0xc0] sm:$0xff]  ;;  %v50_v24 = vld [vmem:[%s2539_s0 + $0x58] sm:$0xff] }
   0x9   :  { %1794 = vmatprep.mubr.msk.f32.mxu0 %vm79_vm0, %v43_v5  ;;  %1837 = vmatpush3.bf16.msra.mxu1 %v2022_v16  ;;  %v2024_v23 = vld [vmem:[%s2540_s3 + $0x10] sm:$0xff]   ;;  %v64_v25 = vld [vmem:[%s2539_s0 + $0xc8] sm:$0xff]  ;;  %v51_v26 = vld [vmem:[%s2539_s0 + $0x60] sm:$0xff] }
   0xa   :  { %1816 = vmatmul.mubr.msk.f32.gmra.mrb[2].mxu1 %vm79_vm0, %v58_v10  ;;  %1838 = vmatprep.subr.bf16.mxu1 %v2023_v18  ;;  %v65_v27 = vld [vmem:[%s2539_s0 + $0xd0] sm:$0xff]  ;;  %v52_v28 = vld [vmem:[%s2539_s0 + $0x68] sm:$0xff]  ;;  %v66_v29 = vld [vmem:[%s2539_s0 + $0xd8] sm:$0xff] }
   0xb   :  { %1818 = vmatprep.mubr.msk.f32.mxu1 %vm79_vm0, %v59_v12  ;;  %v53_v30 = vld [vmem:[%s2539_s0 + $0x70] sm:$0xff]  ;;  %v67_v31 = vld [vmem:[%s2539_s0 + $0xe0] sm:$0xff]  ;;  %v54_v32 = vld [vmem:[%s2539_s0 + $0x78] sm:$0xff] }
   0xc   :  { %1795 = vmatmul.mubr.msk.f32.gmra.mrb[4].mxu0 %vm79_vm0, %v44_v9  ;;  %v68_v33 = vld [vmem:[%s2539_s0 + $0xe8] sm:$0xff]  ;;  %v69_v34 = vld [vmem:[%s2539_s0 + $0xf0] sm:$0xff]  ;;  %v70_v35 = vld [vmem:[%s2539_s0 + $0xf8] sm:$0xff] }
   0xd   :  { %1797 = vmatprep.mubr.msk.f32.mxu0 %vm79_vm0, %v45_v11  ;;  %1839 = vmatpush3.bf16.msra.mxu1 %v2023_v18  ;;  %v2025_v36 = vld [vmem:[%s2540_s3 + $0x18] sm:$0xff]   ;;  %v2026_v37 = vld [vmem:[%s2541_s5] sm:$0xff]   ;;  %v2027_v38 = vld [vmem:[%s2541_s5 + $0x8] sm:$0xff]  }
   0xe   :  { %1819 = vmatmul.mubr.msk.f32.gmra.mrb[4].mxu1 %vm79_vm0, %v60_v14  ;;  %1840 = vmatprep.subr.bf16.mxu1 %v2024_v23  ;;  %v2028_v39 = vld [vmem:[%s2541_s5 + $0x10] sm:$0xff]   ;;  %v2029_v40 = vld [vmem:[%s2541_s5 + $0x18] sm:$0xff]   ;;  %v2030_v41 = vld [vmem:[%s2541_s5 + $0x20] sm:$0xff]  }
   0xf   :  { %1821 = vmatprep.mubr.msk.f32.mxu1 %vm79_vm0, %v61_v17  ;;  %1876 = vmatprep.subr.bf16.mxu0 %v2026_v37  ;;  %v2031_v42 = vld [vmem:[%s2541_s5 + $0x28] sm:$0xff]   ;;  %v2274_v43 = vld [vmem:[%s2542_s2] ss:$0 sm:$0xff] }
  0x10   :  { %1798 = vmatmul.mubr.msk.f32.gmra.mrb[6].mxu0 %vm79_vm0, %v46_v13 }
  0x11   :  { %1800 = vmatprep.mubr.msk.f32.mxu0 %vm79_vm0, %v47_v15  ;;  %1841 = vmatpush3.bf16.msra.mxu1 %v2024_v23 }
  0x12   :  { %1822 = vmatmul.mubr.msk.f32.gmra.mrb[6].mxu1 %vm79_vm0, %v62_v20  ;;  %1842 = vmatprep.subr.bf16.mxu1 %v2025_v36 }
  0x13   :  { %1824 = vmatprep.mubr.msk.f32.mxu1 %vm79_vm0, %v63_v22  ;;  %1877 = vmatpush3.bf16.msra.mxu0 %v2026_v37 }
  0x14   :  { %1801 = vmatmul.mubr.msk.f32.gmra.mrb[8].mxu0 %vm79_vm0, %v48_v19  ;;  %1878 = vmatprep.subr.bf16.mxu0 %v2027_v38 }
  0x15   :  { %1803 = vmatprep.mubr.msk.f32.mxu0 %vm79_vm0, %v49_v21  ;;  %1843 = vmatpush3.bf16.msra.mxu1 %v2025_v36 }
  0x16   :  { %1825 = vmatmul.mubr.msk.f32.gmra.mrb[8].mxu1 %vm79_vm0, %v64_v25 }
  0x17   :  { %1827 = vmatprep.mubr.msk.f32.mxu1 %vm79_vm0, %v65_v27  ;;  %1879 = vmatpush3.bf16.msra.mxu0 %v2027_v38 }
  0x18   :  { %1804 = vmatmul.mubr.msk.f32.gmra.mrb[10].mxu0 %vm79_vm0, %v50_v24  ;;  %1880 = vmatprep.subr.bf16.mxu0 %v2028_v39 }
  0x19   :  { %1806 = vmatprep.mubr.msk.f32.mxu0 %vm79_vm0, %v51_v26 }
  0x1a   :  { %1828 = vmatmul.mubr.msk.f32.gmra.mrb[10].mxu1 %vm79_vm0, %v66_v29 }
  0x1b   :  { %1830 = vmatprep.mubr.msk.f32.mxu1 %vm79_vm0, %v67_v31  ;;  %1881 = vmatpush3.bf16.msra.mxu0 %v2028_v39 }
  0x1c   :  { %1807 = vmatmul.mubr.msk.f32.gmra.mrb[12].mxu0 %vm79_vm0, %v52_v28  ;;  %1882 = vmatprep.subr.bf16.mxu0 %v2029_v40 }
  0x1d   :  { %1809 = vmatprep.mubr.msk.f32.mxu0 %vm79_vm0, %v53_v30 }
  0x1e   :  { %1831 = vmatmul.mubr.msk.f32.gmra.mrb[12].mxu1 %vm79_vm0, %v68_v33 }
  0x1f   :  { %1833 = vmatprep.mubr.msk.f32.mxu1 %vm79_vm0, %v69_v34  ;;  %1883 = vmatpush3.bf16.msra.mxu0 %v2029_v40 }
  0x20   :  { %1810 = vmatmul.mubr.msk.f32.gmra.mrb[14].mxu0 %vm79_vm0, %v54_v32  ;;  %1884 = vmatprep.subr.bf16.mxu0 %v2030_v41 }
  0x22   :  { %1834 = vmatmul.mubr.msk.f32.gmra.mrb[14].mxu1 %vm79_vm0, %v70_v35 }
  0x23   :  { %1885 = vmatpush3.bf16.msra.mxu0 %v2030_v41 }
  0x24   :  { %1886 = vmatprep.subr.bf16.mxu0 %v2031_v42 }
  0x27   :  { %1887 = vmatpush3.bf16.msra.mxu0 %v2031_v42 }
  0xd7   :  { %v1790_v44 = vpop.f32.mrb[0].mxu0 }
  0xd8   :  { %v248_v45 = vadd.f32 %v1790_v44, %v2274_v43  ;;  %v242_v46 = vpop.f32.mrb[1].mxu0 }
  0xd9   :  { %v243_v47 = vadd.f32 %v2274_v43, %v242_v46  ;;  %v1814_v51 = vpop.f32.mrb[0].mxu1 }
  0xda   :  { %v402_v48 = vmax.f32 %v248_v45, 0.0  ;;  %v328_v54 = vadd.f32 %v1814_v51, %v2274_v43  ;;  %v322_v55 = vpop.f32.mrb[1].mxu1 }
  0xdb   :  { %v401_v49 = vmax.f32 %v243_v47, 0.0  ;;  %v1793_v50 = vpop.f32.mrb[2].mxu0  ;;  %v323_v58 = vadd.f32 %v2274_v43, %v322_v55 }
  0xdc   :  { %v258_v52 = vadd.f32 %v1793_v50, %v2274_v43  ;;  %v252_v53 = vpop.f32.mrb[3].mxu0  ;;  %v418_v60 = vmax.f32 %v328_v54, 0.0 }
  0xdd   :  { %v433_v56 = vpack.c.bf16 %v402_v48, %v401_v49  ;;  %v253_v57 = vadd.f32 %v2274_v43, %v252_v53  ;;  %v417_v63 = vmax.f32 %v323_v58, 0.0  ;;  %v1817_v0 = vpop.f32.mrb[2].mxu1 }
  0xde   :  { %v404_v59 = vmax.f32 %v258_v52, 0.0  ;;  %v338_v3 = vadd.f32 %v1817_v0, %v2274_v43  ;;  %v332_v4 = vpop.f32.mrb[3].mxu1 }
  0xdf   :  { %v403_v61 = vmax.f32 %v253_v57, 0.0  ;;  %v1796_v62 = vpop.f32.mrb[4].mxu0  ;;  %1844 = vmatprep.mubr.msk.bf16.mxu1 %vm488_vm1, %v433_v56  ;;  %v2286_v7 = vpack.c.bf16 %v418_v60, %v417_v63  ;;  %v333_v8 = vadd.f32 %v2274_v43, %v332_v4 }
  0xe0   :  { %v268_v1 = vadd.f32 %v1796_v62, %v2274_v43  ;;  %v262_v2 = vpop.f32.mrb[5].mxu0  ;;  %v420_v10 = vmax.f32 %v338_v3, 0.0 }
  0xe1   :  { %v434_v5 = vpack.c.bf16 %v404_v59, %v403_v61  ;;  %v263_v6 = vadd.f32 %v2274_v43, %v262_v2  ;;  %v419_v13 = vmax.f32 %v333_v8, 0.0  ;;  %v1820_v14 = vpop.f32.mrb[4].mxu1 }
  0xe2   :  { %v406_v9 = vmax.f32 %v268_v1, 0.0  ;;  %v348_v17 = vadd.f32 %v1820_v14, %v2274_v43  ;;  %v342_v18 = vpop.f32.mrb[5].mxu1 }
  0xe3   :  { %v405_v11 = vmax.f32 %v263_v6, 0.0  ;;  %v1799_v12 = vpop.f32.mrb[6].mxu0  ;;  %1845 = vmatmul.mubr.msk.bf16.vlgmr.msra.gmra.mrb[16].mxu1 %vm488_vm1, %v434_v5  ;;  %v2293_v21 = vpack.c.bf16 %v420_v10, %v419_v13  ;;  %v343_v22 = vadd.f32 %v2274_v43, %v342_v18 }
  0xe4   :  { %v278_v15 = vadd.f32 %v1799_v12, %v2274_v43  ;;  %v272_v16 = vpop.f32.mrb[7].mxu0  ;;  %v422_v24 = vmax.f32 %v348_v17, 0.0 }
  0xe5   :  { %v435_v19 = vpack.c.bf16 %v406_v9, %v405_v11  ;;  %v273_v20 = vadd.f32 %v2274_v43, %v272_v16  ;;  %v421_v27 = vmax.f32 %v343_v22, 0.0  ;;  %v1823_v28 = vpop.f32.mrb[6].mxu1 }
  0xe6   :  { %v408_v23 = vmax.f32 %v278_v15, 0.0  ;;  %v358_v31 = vadd.f32 %v1823_v28, %v2274_v43  ;;  %v352_v32 = vpop.f32.mrb[7].mxu1 }
  0xe7   :  { %v407_v25 = vmax.f32 %v273_v20, 0.0  ;;  %v1802_v26 = vpop.f32.mrb[8].mxu0  ;;  %1848 = vmatprep.mubr.msk.bf16.mxu1 %vm488_vm1, %v435_v19  ;;  %v2300_v35 = vpack.c.bf16 %v422_v24, %v421_v27  ;;  %v353_v36 = vadd.f32 %v2274_v43, %v352_v32  ;;  %v2036_v32 = vld [vmem:[%s2543_s7 + $0x10] sm:$0xff]  }
  0xe8   :  { %v288_v29 = vadd.f32 %v1802_v26, %v2274_v43  ;;  %v282_v30 = vpop.f32.mrb[9].mxu0  ;;  %v424_v38 = vmax.f32 %v358_v31, 0.0  ;;  %v2035_v31 = vld [vmem:[%s2543_s7 + $0x8] sm:$0xff]  }
  0xe9   :  { %v436_v33 = vpack.c.bf16 %v408_v23, %v407_v25  ;;  %v283_v34 = vadd.f32 %v2274_v43, %v282_v30  ;;  %v423_v41 = vmax.f32 %v353_v36, 0.0  ;;  %v1826_v42 = vpop.f32.mrb[8].mxu1  ;;  %v2040_v36 = vld [vmem:[%s2543_s7 + $0x30] sm:$0xff]  }
  0xea   :  { %v410_v37 = vmax.f32 %v288_v29, 0.0  ;;  %v368_v46 = vadd.f32 %v1826_v42, %v2274_v43  ;;  %v362_v47 = vpop.f32.mrb[9].mxu1 }
  0xeb   :  { %v409_v39 = vmax.f32 %v283_v34, 0.0  ;;  %v1805_v40 = vpop.f32.mrb[10].mxu0  ;;  %1849 = vmatmul.mubr.msk.bf16.gmra.mrb[20].mxu1 %vm488_vm1, %v436_v33  ;;  %v444_v50 = vpack.c.bf16 %v424_v38, %v423_v41  ;;  %v363_v51 = vadd.f32 %v2274_v43, %v362_v47  ;;  %v2037_v33 = vld [vmem:[%s2543_s7 + $0x18] sm:$0xff]   ;;  %v2038_v34 = vld [vmem:[%s2543_s7 + $0x20] sm:$0xff]  }
  0xec   :  { %v298_v44 = vadd.f32 %v1805_v40, %v2274_v43  ;;  %v292_v45 = vpop.f32.mrb[11].mxu0  ;;  %v426_v53 = vmax.f32 %v368_v46, 0.0 }
  0xed   :  { %v437_v48 = vpack.c.bf16 %v410_v37, %v409_v39  ;;  %v293_v49 = vadd.f32 %v2274_v43, %v292_v45  ;;  %v425_v56 = vmax.f32 %v363_v51, 0.0  ;;  %v1829_v57 = vpop.f32.mrb[10].mxu1  ;;  %v2363_v37 = vld [vmem:[%s2544_s4] ss:$0 sm:$0xff] }
  0xee   :  { %v412_v52 = vmax.f32 %v298_v44, 0.0  ;;  %v378_v60 = vadd.f32 %v1829_v57, %v2274_v43  ;;  %v372_v61 = vpop.f32.mrb[11].mxu1 }
  0xef   :  { %v411_v54 = vmax.f32 %v293_v49, 0.0  ;;  %v1808_v55 = vpop.f32.mrb[12].mxu0  ;;  %1852 = vmatprep.mubr.msk.bf16.mxu1 %vm488_vm1, %v437_v48  ;;  %v445_v0 = vpack.c.bf16 %v426_v53, %v425_v56  ;;  %v373_v1 = vadd.f32 %v2274_v43, %v372_v61 }
  0xf0   :  { %v308_v58 = vadd.f32 %v1808_v55, %v2274_v43  ;;  %v302_v59 = vpop.f32.mrb[13].mxu0  ;;  %v428_v3 = vmax.f32 %v378_v60, 0.0 }
  0xf1   :  { %v438_v62 = vpack.c.bf16 %v412_v52, %v411_v54  ;;  %v303_v63 = vadd.f32 %v2274_v43, %v302_v59  ;;  %v427_v6 = vmax.f32 %v373_v1, 0.0  ;;  %v1832_v8 = vpop.f32.mrb[12].mxu1 }
  0xf2   :  { %v414_v2 = vmax.f32 %v308_v58, 0.0  ;;  %v388_v11 = vadd.f32 %v1832_v8, %v2274_v43  ;;  %v382_v12 = vpop.f32.mrb[13].mxu1 }
  0xf3   :  { %v413_v4 = vmax.f32 %v303_v63, 0.0  ;;  %v1811_v5 = vpop.f32.mrb[14].mxu0  ;;  %1853 = vmatmul.mubr.msk.bf16.gmra.mrb[24].mxu1 %vm488_vm1, %v438_v62  ;;  %v446_v15 = vpack.c.bf16 %v428_v3, %v427_v6  ;;  %v383_v16 = vadd.f32 %v2274_v43, %v382_v12 }
  0xf4   :  { %v318_v9 = vadd.f32 %v1811_v5, %v2274_v43  ;;  %v312_v10 = vpop.f32.mrb[15].mxu0  ;;  %v430_v18 = vmax.f32 %v388_v11, 0.0 }
  0xf5   :  { %v439_v13 = vpack.c.bf16 %v414_v2, %v413_v4  ;;  %v313_v14 = vadd.f32 %v2274_v43, %v312_v10  ;;  %v429_v20 = vmax.f32 %v383_v16, 0.0  ;;  %v1835_v22 = vpop.f32.mrb[14].mxu1 }
  0xf6   :  { %v416_v17 = vmax.f32 %v318_v9, 0.0  ;;  %v398_v23 = vadd.f32 %v1835_v22, %v2274_v43  ;;  %v392_v24 = vpop.f32.mrb[15].mxu1 }
  0xf7   :  { %v415_v19 = vmax.f32 %v313_v14, 0.0  ;;  %1856 = vmatprep.mubr.msk.bf16.mxu1 %vm488_vm1, %v439_v13  ;;  %v447_v26 = vpack.c.bf16 %v430_v18, %v429_v20  ;;  %v393_v27 = vadd.f32 %v2274_v43, %v392_v24  ;;  %v2032_v43 = vld [vmem:[%s2541_s5 + $0x30] sm:$0xff]  }
  0xf8   :  { %v432_v28 = vmax.f32 %v398_v23, 0.0  ;;  %1888 = vmatprep.subr.bf16.mxu0 %v2032_v43 }
  0xf9   :  { %v440_v25 = vpack.c.bf16 %v416_v17, %v415_v19  ;;  %v431_v29 = vmax.f32 %v393_v27, 0.0  ;;  %1889 = vmatpush3.bf16.msra.mxu0 %v2032_v43 }
  0xfb   :  { %1857 = vmatmul.mubr.msk.bf16.gmra.mrb[28].mxu1 %vm488_vm1, %v440_v25  ;;  %v448_v30 = vpack.c.bf16 %v432_v28, %v431_v29 }
  0xfc   :  { %1860 = vmatprep.mubr.msk.bf16.mxu1 %vm488_vm1, %v2286_v7  ;;  %v2033_v7 = vld [vmem:[%s2541_s5 + $0x38] sm:$0xff]  }
  0xfd   :  { %1890 = vmatprep.subr.bf16.mxu0 %v2033_v7 }
  0xfe   :  { %1891 = vmatpush3.bf16.msra.mxu0 %v2033_v7 }
 0x103   :  { %1861 = vmatmul.mubr.msk.bf16.gmra.mrb[32].mxu1 %vm488_vm1, %v2293_v21  ;;  %v2034_v21 = vld [vmem:[%s2543_s7] sm:$0xff]  }
 0x104   :  { %1864 = vmatprep.mubr.msk.bf16.mxu1 %vm488_vm1, %v2300_v35  ;;  %1924 = vmatprep.subr.bf16.mxu1 %v2034_v21  ;;  %v2039_v35 = vld [vmem:[%s2543_s7 + $0x28] sm:$0xff]  }
 0x105   :  { %1925 = vmatpush3.bf16.msra.mxu1 %v2034_v21 }
 0x106   :  { %1926 = vmatprep.subr.bf16.mxu1 %v2035_v31 }
 0x109   :  { %1927 = vmatpush3.bf16.msra.mxu1 %v2035_v31 }
 0x10a   :  { %1928 = vmatprep.subr.bf16.mxu1 %v2036_v32 }
 0x10b   :  { %1865 = vmatmul.mubr.msk.bf16.gmra.mrb[36].mxu1 %vm488_vm1, %v444_v50 }
 0x10c   :  { %1868 = vmatprep.mubr.msk.bf16.mxu1 %vm488_vm1, %v445_v0 }
 0x10d   :  { %1929 = vmatpush3.bf16.msra.mxu1 %v2036_v32 }
 0x10e   :  { %1930 = vmatprep.subr.bf16.mxu1 %v2037_v33 }
 0x111   :  { %1931 = vmatpush3.bf16.msra.mxu1 %v2037_v33 }
 0x112   :  { %1932 = vmatprep.subr.bf16.mxu1 %v2038_v34 }
 0x113   :  { %1869 = vmatmul.mubr.msk.bf16.gmra.mrb[40].mxu1 %vm488_vm1, %v446_v15 }
 0x114   :  { %1872 = vmatprep.mubr.msk.bf16.mxu1 %vm488_vm1, %v447_v26 }
 0x115   :  { %1933 = vmatpush3.bf16.msra.mxu1 %v2038_v34 }
 0x116   :  { %1934 = vmatprep.subr.bf16.mxu1 %v2039_v35 }
 0x119   :  { %1935 = vmatpush3.bf16.msra.mxu1 %v2039_v35 }
 0x11a   :  { %1936 = vmatprep.subr.bf16.mxu1 %v2040_v36 }
 0x11b   :  { %1873 = vmatmul.mubr.msk.bf16.gmra.mrb[44].mxu1 %vm488_vm1, %v448_v30 }
 0x11d   :  { %1937 = vmatpush3.bf16.msra.mxu1 %v2040_v36 }
 0x1b6   :  { %v1846_v38 = vpop.f32.mrb[16].mxu1 }
 0x1b7   :  { %v580_v39 = vadd.f32 %v1846_v38, %v2363_v37  ;;  %v571_v40 = vpop.f32.mrb[17].mxu1 }
 0x1b8   :  { %v572_v41 = vadd.f32 %v2363_v37, %v571_v40  ;;  %v1847_v42 = vpop.f32.mrb[18].mxu1 }
 0x1b9   :  { %v583_v44 = vadd.f32 %v1847_v42, %v2363_v37  ;;  %v574_v45 = vpop.f32.mrb[19].mxu1  ;;  %v700_v47 = vmax.f32 %v580_v39, 0.0 }
 0x1ba   :  { %v575_v46 = vadd.f32 %v2363_v37, %v574_v45  ;;  %v698_v49 = vmax.f32 %v572_v41, 0.0 }
 0x1bb   :  { %v701_v48 = vmax.f32 %v583_v44, 0.0 }
 0x1bc   :  { %v699_v50 = vmax.f32 %v575_v46, 0.0 }
 0x1bd   :  { %v731_v51 = vpack.c.bf16 %v701_v48, %v700_v47 }
 0x1be   :  { %v730_v52 = vpack.c.bf16 %v699_v50, %v698_v49  ;;  %v1850_v53 = vpop.f32.mrb[20].mxu1 }
 0x1bf   :  { %v596_v54 = vadd.f32 %v1850_v53, %v2363_v37  ;;  %v587_v55 = vpop.f32.mrb[21].mxu1 }
 0x1c0   :  { %v588_v56 = vadd.f32 %v2363_v37, %v587_v55  ;;  %v1851_v57 = vpop.f32.mrb[22].mxu1  ;;  %1892 = vmatprep.mubr.bf16.mxu0 %v730_v52 }
 0x1c1   :  { %v599_v58 = vadd.f32 %v1851_v57, %v2363_v37  ;;  %v590_v59 = vpop.f32.mrb[23].mxu1  ;;  %1893 = vmatmul.mubr.bf16.vlgmr.msra.gmra.mrb[16].mxu0 %v731_v51  ;;  %v704_v61 = vmax.f32 %v596_v54, 0.0 }
 0x1c2   :  { %v591_v60 = vadd.f32 %v2363_v37, %v590_v59  ;;  %v702_v63 = vmax.f32 %v588_v56, 0.0 }
 0x1c3   :  { %v705_v62 = vmax.f32 %v599_v58, 0.0 }
 0x1c4   :  { %v703_v0 = vmax.f32 %v591_v60, 0.0 }
 0x1c5   :  { %v733_v1 = vpack.c.bf16 %v705_v62, %v704_v61 }
 0x1c6   :  { %v732_v2 = vpack.c.bf16 %v703_v0, %v702_v63  ;;  %v1854_v3 = vpop.f32.mrb[24].mxu1 }
 0x1c7   :  { %v612_v4 = vadd.f32 %v1854_v3, %v2363_v37  ;;  %v603_v5 = vpop.f32.mrb[25].mxu1 }
 0x1c8   :  { %v604_v6 = vadd.f32 %v2363_v37, %v603_v5  ;;  %v1855_v8 = vpop.f32.mrb[26].mxu1  ;;  %1896 = vmatprep.mubr.bf16.mxu0 %v732_v2 }
 0x1c9   :  { %v615_v9 = vadd.f32 %v1855_v8, %v2363_v37  ;;  %v606_v10 = vpop.f32.mrb[27].mxu1  ;;  %1897 = vmatmul.mubr.bf16.gmra.mrb[20].mxu0 %v733_v1  ;;  %v708_v12 = vmax.f32 %v612_v4, 0.0 }
 0x1ca   :  { %v607_v11 = vadd.f32 %v2363_v37, %v606_v10  ;;  %v706_v14 = vmax.f32 %v604_v6, 0.0 }
 0x1cb   :  { %v709_v13 = vmax.f32 %v615_v9, 0.0 }
 0x1cc   :  { %v707_v15 = vmax.f32 %v607_v11, 0.0 }
 0x1cd   :  { %v735_v16 = vpack.c.bf16 %v709_v13, %v708_v12 }
 0x1ce   :  { %v734_v17 = vpack.c.bf16 %v707_v15, %v706_v14  ;;  %v1858_v18 = vpop.f32.mrb[28].mxu1 }
 0x1cf   :  { %v628_v19 = vadd.f32 %v1858_v18, %v2363_v37  ;;  %v619_v20 = vpop.f32.mrb[29].mxu1 }
 0x1d0   :  { %v620_v22 = vadd.f32 %v2363_v37, %v619_v20  ;;  %v1859_v23 = vpop.f32.mrb[30].mxu1  ;;  %1900 = vmatprep.mubr.bf16.mxu0 %v734_v17 }
 0x1d1   :  { %v631_v24 = vadd.f32 %v1859_v23, %v2363_v37  ;;  %v622_v25 = vpop.f32.mrb[31].mxu1  ;;  %1901 = vmatmul.mubr.bf16.gmra.mrb[24].mxu0 %v735_v16  ;;  %v712_v27 = vmax.f32 %v628_v19, 0.0 }
 0x1d2   :  { %v623_v26 = vadd.f32 %v2363_v37, %v622_v25  ;;  %v710_v29 = vmax.f32 %v620_v22, 0.0 }
 0x1d3   :  { %v713_v28 = vmax.f32 %v631_v24, 0.0 }
 0x1d4   :  { %v711_v30 = vmax.f32 %v623_v26, 0.0  ;;  %v2041_v26 = vld [vmem:[%s2543_s7 + $0x38] sm:$0xff]  }
 0x1d5   :  { %v737_v43 = vpack.c.bf16 %v713_v28, %v712_v27  ;;  %1938 = vmatprep.subr.bf16.mxu1 %v2041_v26  ;;  %v2042_v27 = vld [vmem:[%s2545_s9] sm:$0xff]   ;;  %v2044_v28 = vld [vmem:[%s2545_s9 + $0x10] sm:$0xff]  }
 0x1d6   :  { %v736_v7 = vpack.c.bf16 %v711_v30, %v710_v29  ;;  %v1862_v21 = vpop.f32.mrb[32].mxu1  ;;  %1939 = vmatpush3.bf16.msra.mxu1 %v2041_v26  ;;  %1972 = vmatprep.subr.bf16.mxu0 %v2042_v27  ;;  %v2045_v29 = vld [vmem:[%s2545_s9 + $0x18] sm:$0xff]   ;;  %v2046_v30 = vld [vmem:[%s2545_s9 + $0x20] sm:$0xff]  }
 0x1d7   :  { %v644_v31 = vadd.f32 %v1862_v21, %v2363_v37  ;;  %v635_v32 = vpop.f32.mrb[33].mxu1  ;;  %1973 = vmatpush3.bf16.msra.mxu0 %v2042_v27  ;;  %v2424_v21 = vld [vmem:[%s2546_s6] ss:$0 sm:$0xff] }
 0x1d8   :  { %v636_v33 = vadd.f32 %v2363_v37, %v635_v32  ;;  %v1863_v34 = vpop.f32.mrb[34].mxu1  ;;  %1904 = vmatprep.mubr.bf16.mxu0 %v736_v7  ;;  %v2048_v7 = vld [vmem:[%s2545_s9 + $0x30] sm:$0xff]  }
 0x1d9   :  { %v647_v35 = vadd.f32 %v1863_v34, %v2363_v37  ;;  %v638_v36 = vpop.f32.mrb[35].mxu1  ;;  %1905 = vmatmul.mubr.bf16.gmra.mrb[28].mxu0 %v737_v43  ;;  %v716_v39 = vmax.f32 %v644_v31, 0.0  ;;  %v2047_v43 = vld [vmem:[%s2545_s9 + $0x28] sm:$0xff]  }
 0x1da   :  { %v639_v38 = vadd.f32 %v2363_v37, %v638_v36  ;;  %v714_v41 = vmax.f32 %v636_v33, 0.0 }
 0x1db   :  { %v717_v40 = vmax.f32 %v647_v35, 0.0 }
 0x1dc   :  { %v715_v42 = vmax.f32 %v639_v38, 0.0 }
 0x1dd   :  { %v739_v44 = vpack.c.bf16 %v717_v40, %v716_v39 }
 0x1de   :  { %v738_v45 = vpack.c.bf16 %v715_v42, %v714_v41  ;;  %v1866_v46 = vpop.f32.mrb[36].mxu1 }
 0x1df   :  { %v660_v47 = vadd.f32 %v1866_v46, %v2363_v37  ;;  %v651_v48 = vpop.f32.mrb[37].mxu1 }
 0x1e0   :  { %v652_v49 = vadd.f32 %v2363_v37, %v651_v48  ;;  %v1867_v50 = vpop.f32.mrb[38].mxu1  ;;  %1908 = vmatprep.mubr.bf16.mxu0 %v738_v45 }
 0x1e1   :  { %v663_v51 = vadd.f32 %v1867_v50, %v2363_v37  ;;  %v654_v52 = vpop.f32.mrb[39].mxu1  ;;  %1909 = vmatmul.mubr.bf16.gmra.mrb[32].mxu0 %v739_v44  ;;  %v720_v54 = vmax.f32 %v660_v47, 0.0 }
 0x1e2   :  { %v655_v53 = vadd.f32 %v2363_v37, %v654_v52  ;;  %v718_v56 = vmax.f32 %v652_v49, 0.0 }
 0x1e3   :  { %v721_v55 = vmax.f32 %v663_v51, 0.0 }
 0x1e4   :  { %v719_v57 = vmax.f32 %v655_v53, 0.0 }
 0x1e5   :  { %v741_v58 = vpack.c.bf16 %v721_v55, %v720_v54 }
 0x1e6   :  { %v740_v59 = vpack.c.bf16 %v719_v57, %v718_v56  ;;  %v1870_v60 = vpop.f32.mrb[40].mxu1 }
 0x1e7   :  { %v676_v61 = vadd.f32 %v1870_v60, %v2363_v37  ;;  %v667_v62 = vpop.f32.mrb[41].mxu1 }
 0x1e8   :  { %v668_v63 = vadd.f32 %v2363_v37, %v667_v62  ;;  %v1871_v0 = vpop.f32.mrb[42].mxu1  ;;  %1912 = vmatprep.mubr.bf16.mxu0 %v740_v59 }
 0x1e9   :  { %v679_v1 = vadd.f32 %v1871_v0, %v2363_v37  ;;  %v670_v2 = vpop.f32.mrb[43].mxu1  ;;  %1913 = vmatmul.mubr.bf16.gmra.mrb[36].mxu0 %v741_v58  ;;  %v724_v4 = vmax.f32 %v676_v61, 0.0 }
 0x1ea   :  { %v671_v3 = vadd.f32 %v2363_v37, %v670_v2  ;;  %v722_v6 = vmax.f32 %v668_v63, 0.0 }
 0x1eb   :  { %v725_v5 = vmax.f32 %v679_v1, 0.0 }
 0x1ec   :  { %v723_v8 = vmax.f32 %v671_v3, 0.0 }
 0x1ed   :  { %v743_v9 = vpack.c.bf16 %v725_v5, %v724_v4 }
 0x1ee   :  { %v742_v10 = vpack.c.bf16 %v723_v8, %v722_v6  ;;  %v1874_v11 = vpop.f32.mrb[44].mxu1 }
 0x1ef   :  { %v692_v12 = vadd.f32 %v1874_v11, %v2363_v37  ;;  %v683_v13 = vpop.f32.mrb[45].mxu1 }
 0x1f0   :  { %v684_v14 = vadd.f32 %v2363_v37, %v683_v13  ;;  %v1875_v15 = vpop.f32.mrb[46].mxu1  ;;  %1916 = vmatprep.mubr.bf16.mxu0 %v742_v10 }
 0x1f1   :  { %v695_v16 = vadd.f32 %v1875_v15, %v2363_v37  ;;  %v686_v17 = vpop.f32.mrb[47].mxu1  ;;  %1917 = vmatmul.mubr.bf16.gmra.mrb[40].mxu0 %v743_v9  ;;  %v728_v19 = vmax.f32 %v692_v12, 0.0 }
 0x1f2   :  { %v687_v18 = vadd.f32 %v2363_v37, %v686_v17  ;;  %v726_v22 = vmax.f32 %v684_v14, 0.0  ;;  %v2043_v37 = vld [vmem:[%s2545_s9 + $0x8] sm:$0xff]  }
 0x1f3   :  { %v729_v20 = vmax.f32 %v695_v16, 0.0  ;;  %1974 = vmatprep.subr.bf16.mxu0 %v2043_v37 }
 0x1f4   :  { %v727_v23 = vmax.f32 %v687_v18, 0.0  ;;  %1975 = vmatpush3.bf16.msra.mxu0 %v2043_v37 }
 0x1f5   :  { %v745_v24 = vpack.c.bf16 %v729_v20, %v728_v19  ;;  %1976 = vmatprep.subr.bf16.mxu0 %v2044_v28 }
 0x1f6   :  { %v744_v25 = vpack.c.bf16 %v727_v23, %v726_v22 }
 0x1f8   :  { %1920 = vmatprep.mubr.bf16.mxu0 %v744_v25  ;;  %1977 = vmatpush3.bf16.msra.mxu0 %v2044_v28 }
 0x1f9   :  { %1921 = vmatmul.mubr.bf16.gmra.mrb[44].mxu0 %v745_v24  ;;  %1978 = vmatprep.subr.bf16.mxu0 %v2045_v29 }
 0x1fc   :  { %1979 = vmatpush3.bf16.msra.mxu0 %v2045_v29 }
 0x1fd   :  { %1980 = vmatprep.subr.bf16.mxu0 %v2046_v30 }
 0x200   :  { %1981 = vmatpush3.bf16.msra.mxu0 %v2046_v30 }
 0x201   :  { %1982 = vmatprep.subr.bf16.mxu0 %v2047_v43 }
 0x204   :  { %1983 = vmatpush3.bf16.msra.mxu0 %v2047_v43 }
 0x205   :  { %1984 = vmatprep.subr.bf16.mxu0 %v2048_v7 }
 0x208   :  { %1985 = vmatpush3.bf16.msra.mxu0 %v2048_v7 }
 0x294   :  { %v1894_v31 = vpop.f32.mrb[16].mxu0 }
 0x295   :  { %v860_v32 = vadd.f32 %v1894_v31, %v2424_v21  ;;  %v851_v33 = vpop.f32.mrb[17].mxu0 }
 0x296   :  { %v852_v34 = vadd.f32 %v2424_v21, %v851_v33  ;;  %v1895_v35 = vpop.f32.mrb[18].mxu0 }
 0x297   :  { %v863_v36 = vadd.f32 %v1895_v35, %v2424_v21  ;;  %v854_v38 = vpop.f32.mrb[19].mxu0  ;;  %v980_v40 = vmax.f32 %v860_v32, 0.0 }
 0x298   :  { %v855_v39 = vadd.f32 %v2424_v21, %v854_v38  ;;  %v978_v42 = vmax.f32 %v852_v34, 0.0 }
 0x299   :  { %v981_v41 = vmax.f32 %v863_v36, 0.0 }
 0x29a   :  { %v979_v44 = vmax.f32 %v855_v39, 0.0 }
 0x29b   :  { %v1011_v45 = vpack.c.bf16 %v981_v41, %v980_v40 }
 0x29c   :  { %v1010_v46 = vpack.c.bf16 %v979_v44, %v978_v42  ;;  %v1898_v47 = vpop.f32.mrb[20].mxu0 }
 0x29d   :  { %v876_v48 = vadd.f32 %v1898_v47, %v2424_v21  ;;  %v867_v49 = vpop.f32.mrb[21].mxu0 }
 0x29e   :  { %v868_v50 = vadd.f32 %v2424_v21, %v867_v49  ;;  %v1899_v51 = vpop.f32.mrb[22].mxu0  ;;  %1940 = vmatprep.mubr.bf16.mxu1 %v1010_v46 }
 0x29f   :  { %v879_v52 = vadd.f32 %v1899_v51, %v2424_v21  ;;  %v870_v53 = vpop.f32.mrb[23].mxu0  ;;  %1941 = vmatmul.mubr.bf16.vlgmr.msra.gmra.mrb[48].mxu1 %v1011_v45  ;;  %v984_v55 = vmax.f32 %v876_v48, 0.0 }
 0x2a0   :  { %v871_v54 = vadd.f32 %v2424_v21, %v870_v53  ;;  %v982_v57 = vmax.f32 %v868_v50, 0.0 }
 0x2a1   :  { %v985_v56 = vmax.f32 %v879_v52, 0.0 }
 0x2a2   :  { %v983_v58 = vmax.f32 %v871_v54, 0.0 }
 0x2a3   :  { %v1013_v59 = vpack.c.bf16 %v985_v56, %v984_v55 }
 0x2a4   :  { %v1012_v60 = vpack.c.bf16 %v983_v58, %v982_v57  ;;  %v1902_v61 = vpop.f32.mrb[24].mxu0 }
 0x2a5   :  { %v892_v62 = vadd.f32 %v1902_v61, %v2424_v21  ;;  %v883_v63 = vpop.f32.mrb[25].mxu0 }
 0x2a6   :  { %v884_v0 = vadd.f32 %v2424_v21, %v883_v63  ;;  %v1903_v1 = vpop.f32.mrb[26].mxu0  ;;  %1944 = vmatprep.mubr.bf16.mxu1 %v1012_v60 }
 0x2a7   :  { %v895_v2 = vadd.f32 %v1903_v1, %v2424_v21  ;;  %v886_v3 = vpop.f32.mrb[27].mxu0  ;;  %1945 = vmatmul.mubr.bf16.gmra.mrb[52].mxu1 %v1013_v59  ;;  %v988_v5 = vmax.f32 %v892_v62, 0.0 }
 0x2a8   :  { %v887_v4 = vadd.f32 %v2424_v21, %v886_v3  ;;  %v986_v8 = vmax.f32 %v884_v0, 0.0 }
 0x2a9   :  { %v989_v6 = vmax.f32 %v895_v2, 0.0 }
 0x2aa   :  { %v987_v9 = vmax.f32 %v887_v4, 0.0 }
 0x2ab   :  { %v1015_v10 = vpack.c.bf16 %v989_v6, %v988_v5 }
 0x2ac   :  { %v1014_v11 = vpack.c.bf16 %v987_v9, %v986_v8  ;;  %v1906_v12 = vpop.f32.mrb[28].mxu0 }
 0x2ad   :  { %v908_v13 = vadd.f32 %v1906_v12, %v2424_v21  ;;  %v899_v14 = vpop.f32.mrb[29].mxu0 }
 0x2ae   :  { %v900_v15 = vadd.f32 %v2424_v21, %v899_v14  ;;  %v1907_v16 = vpop.f32.mrb[30].mxu0  ;;  %1948 = vmatprep.mubr.bf16.mxu1 %v1014_v11 }
 0x2af   :  { %v911_v17 = vadd.f32 %v1907_v16, %v2424_v21  ;;  %v902_v18 = vpop.f32.mrb[31].mxu0  ;;  %1949 = vmatmul.mubr.bf16.gmra.mrb[56].mxu1 %v1015_v10  ;;  %v992_v20 = vmax.f32 %v908_v13, 0.0 }
 0x2b0   :  { %v903_v19 = vadd.f32 %v2424_v21, %v902_v18  ;;  %v990_v23 = vmax.f32 %v900_v15, 0.0 }
 0x2b1   :  { %v993_v22 = vmax.f32 %v911_v17, 0.0 }
 0x2b2   :  { %v991_v24 = vmax.f32 %v903_v19, 0.0  ;;  %v2049_v19 = vld [vmem:[%s2545_s9 + $0x38] sm:$0xff]  }
 0x2b3   :  { %v1017_v25 = vpack.c.bf16 %v993_v22, %v992_v20  ;;  %1986 = vmatprep.subr.bf16.mxu0 %v2049_v19  ;;  %v2464_v20 = vld [vmem:[%s2547_s8] ss:$0 sm:$0xff] }
 0x2b4   :  { %v1016_v26 = vpack.c.bf16 %v991_v24, %v990_v23  ;;  %v1910_v27 = vpop.f32.mrb[32].mxu0  ;;  %1987 = vmatpush3.bf16.msra.mxu0 %v2049_v19 }
 0x2b5   :  { %v924_v37 = vadd.f32 %v1910_v27, %v2424_v21  ;;  %v915_v28 = vpop.f32.mrb[33].mxu0 }
 0x2b6   :  { %v916_v29 = vadd.f32 %v2424_v21, %v915_v28  ;;  %v1911_v30 = vpop.f32.mrb[34].mxu0  ;;  %1952 = vmatprep.mubr.bf16.mxu1 %v1016_v26 }
 0x2b7   :  { %v927_v43 = vadd.f32 %v1911_v30, %v2424_v21  ;;  %v918_v7 = vpop.f32.mrb[35].mxu0  ;;  %1953 = vmatmul.mubr.bf16.gmra.mrb[60].mxu1 %v1017_v25  ;;  %v996_v32 = vmax.f32 %v924_v37, 0.0 }
 0x2b8   :  { %v919_v31 = vadd.f32 %v2424_v21, %v918_v7  ;;  %v994_v34 = vmax.f32 %v916_v29, 0.0 }
 0x2b9   :  { %v997_v33 = vmax.f32 %v927_v43, 0.0 }
 0x2ba   :  { %v995_v35 = vmax.f32 %v919_v31, 0.0 }
 0x2bb   :  { %v1019_v36 = vpack.c.bf16 %v997_v33, %v996_v32 }
 0x2bc   :  { %v1018_v38 = vpack.c.bf16 %v995_v35, %v994_v34  ;;  %v1914_v39 = vpop.f32.mrb[36].mxu0 }
 0x2bd   :  { %v940_v40 = vadd.f32 %v1914_v39, %v2424_v21  ;;  %v931_v41 = vpop.f32.mrb[37].mxu0 }
 0x2be   :  { %v932_v42 = vadd.f32 %v2424_v21, %v931_v41  ;;  %v1915_v44 = vpop.f32.mrb[38].mxu0  ;;  %1956 = vmatprep.mubr.bf16.mxu1 %v1018_v38 }
 0x2bf   :  { %v943_v45 = vadd.f32 %v1915_v44, %v2424_v21  ;;  %v934_v46 = vpop.f32.mrb[39].mxu0  ;;  %1957 = vmatmul.mubr.bf16.gmra.mrb[64].mxu1 %v1019_v36  ;;  %v1000_v48 = vmax.f32 %v940_v40, 0.0 }
 0x2c0   :  { %v935_v47 = vadd.f32 %v2424_v21, %v934_v46  ;;  %v998_v50 = vmax.f32 %v932_v42, 0.0 }
 0x2c1   :  { %v1001_v49 = vmax.f32 %v943_v45, 0.0 }
 0x2c2   :  { %v999_v51 = vmax.f32 %v935_v47, 0.0 }
 0x2c3   :  { %v1021_v52 = vpack.c.bf16 %v1001_v49, %v1000_v48 }
 0x2c4   :  { %v1020_v53 = vpack.c.bf16 %v999_v51, %v998_v50  ;;  %v1918_v54 = vpop.f32.mrb[40].mxu0 }
 0x2c5   :  { %v956_v55 = vadd.f32 %v1918_v54, %v2424_v21  ;;  %v947_v56 = vpop.f32.mrb[41].mxu0 }
 0x2c6   :  { %v948_v57 = vadd.f32 %v2424_v21, %v947_v56  ;;  %v1919_v58 = vpop.f32.mrb[42].mxu0  ;;  %1960 = vmatprep.mubr.bf16.mxu1 %v1020_v53 }
 0x2c7   :  { %v959_v59 = vadd.f32 %v1919_v58, %v2424_v21  ;;  %v950_v60 = vpop.f32.mrb[43].mxu0  ;;  %1961 = vmatmul.mubr.bf16.gmra.mrb[68].mxu1 %v1021_v52  ;;  %v1004_v62 = vmax.f32 %v956_v55, 0.0 }
 0x2c8   :  { %v951_v61 = vadd.f32 %v2424_v21, %v950_v60  ;;  %v1002_v0 = vmax.f32 %v948_v57, 0.0 }
 0x2c9   :  { %v1005_v63 = vmax.f32 %v959_v59, 0.0 }
 0x2ca   :  { %v1003_v1 = vmax.f32 %v951_v61, 0.0 }
 0x2cb   :  { %v1023_v2 = vpack.c.bf16 %v1005_v63, %v1004_v62 }
 0x2cc   :  { %v1022_v3 = vpack.c.bf16 %v1003_v1, %v1002_v0  ;;  %v1922_v4 = vpop.f32.mrb[44].mxu0 }
 0x2cd   :  { %v972_v5 = vadd.f32 %v1922_v4, %v2424_v21  ;;  %v963_v6 = vpop.f32.mrb[45].mxu0 }
 0x2ce   :  { %v964_v8 = vadd.f32 %v2424_v21, %v963_v6  ;;  %v1923_v9 = vpop.f32.mrb[46].mxu0  ;;  %1964 = vmatprep.mubr.bf16.mxu1 %v1022_v3 }
 0x2cf   :  { %v975_v10 = vadd.f32 %v1923_v9, %v2424_v21  ;;  %v966_v11 = vpop.f32.mrb[47].mxu0  ;;  %1965 = vmatmul.mubr.bf16.gmra.mrb[72].mxu1 %v1023_v2  ;;  %v1008_v13 = vmax.f32 %v972_v5, 0.0 }
 0x2d0   :  { %v967_v12 = vadd.f32 %v2424_v21, %v966_v11  ;;  %v1006_v15 = vmax.f32 %v964_v8, 0.0 }
 0x2d1   :  { %v1009_v14 = vmax.f32 %v975_v10, 0.0 }
 0x2d2   :  { %v1007_v16 = vmax.f32 %v967_v12, 0.0 }
 0x2d3   :  { %v1025_v17 = vpack.c.bf16 %v1009_v14, %v1008_v13 }
 0x2d4   :  { %v1024_v18 = vpack.c.bf16 %v1007_v16, %v1006_v15 }
 0x2d6   :  { %1968 = vmatprep.mubr.bf16.mxu1 %v1024_v18 }
 0x2d7   :  { %1969 = vmatmul.mubr.bf16.gmra.mrb[76].mxu1 %v1025_v17 }
 0x372   :  { %v1942_v21 = vpop.f32.mrb[48].mxu1 }
 0x373   :  { %v1140_v22 = vadd.f32 %v1942_v21, %v2464_v20  ;;  %v1131_v23 = vpop.f32.mrb[49].mxu1 }
 0x374   :  { %v1132_v24 = vadd.f32 %v2464_v20, %v1131_v23  ;;  %v1943_v25 = vpop.f32.mrb[50].mxu1 }
 0x375   :  { %v1143_v26 = vadd.f32 %v1943_v25, %v2464_v20  ;;  %v1134_v27 = vpop.f32.mrb[51].mxu1  ;;  %v1260_v28 = vmax.f32 %v1140_v22, 0.0 }
 0x376   :  { %v1135_v37 = vadd.f32 %v2464_v20, %v1134_v27  ;;  %v1258_v30 = vmax.f32 %v1132_v24, 0.0 }
 0x377   :  { %v1261_v29 = vmax.f32 %v1143_v26, 0.0 }
 0x378   :  { %v1259_v43 = vmax.f32 %v1135_v37, 0.0 }
 0x379   :  { %v1291_v7 = vpack.c.bf16 %v1261_v29, %v1260_v28 }
 0x37a   :  { %v1290_v31 = vpack.c.bf16 %v1259_v43, %v1258_v30  ;;  %v1946_v32 = vpop.f32.mrb[52].mxu1 }
 0x37b   :  { %v1156_v33 = vadd.f32 %v1946_v32, %v2464_v20  ;;  %v1147_v34 = vpop.f32.mrb[53].mxu1 }
 0x37c   :  { %v1148_v35 = vadd.f32 %v2464_v20, %v1147_v34  ;;  %v1947_v36 = vpop.f32.mrb[54].mxu1  ;;  %1988 = vmatprep.mubr.bf16.mxu0 %v1290_v31 }
 0x37d   :  { %v1159_v38 = vadd.f32 %v1947_v36, %v2464_v20  ;;  %v1150_v39 = vpop.f32.mrb[55].mxu1  ;;  %1989 = vmatmul.mubr.bf16.vlgmr.msra.gmra.mrb[48].mxu0 %v1291_v7  ;;  %v1264_v41 = vmax.f32 %v1156_v33, 0.0 }
 0x37e   :  { %v1151_v40 = vadd.f32 %v2464_v20, %v1150_v39  ;;  %v1262_v44 = vmax.f32 %v1148_v35, 0.0 }
 0x37f   :  { %v1265_v42 = vmax.f32 %v1159_v38, 0.0 }
 0x380   :  { %v1263_v45 = vmax.f32 %v1151_v40, 0.0 }
 0x381   :  { %v1293_v46 = vpack.c.bf16 %v1265_v42, %v1264_v41 }
 0x382   :  { %v1292_v47 = vpack.c.bf16 %v1263_v45, %v1262_v44  ;;  %v1950_v48 = vpop.f32.mrb[56].mxu1 }
 0x383   :  { %v1172_v49 = vadd.f32 %v1950_v48, %v2464_v20  ;;  %v1163_v50 = vpop.f32.mrb[57].mxu1 }
 0x384   :  { %v1164_v51 = vadd.f32 %v2464_v20, %v1163_v50  ;;  %v1951_v52 = vpop.f32.mrb[58].mxu1  ;;  %1992 = vmatprep.mubr.bf16.mxu0 %v1292_v47 }
 0x385   :  { %v1175_v53 = vadd.f32 %v1951_v52, %v2464_v20  ;;  %v1166_v54 = vpop.f32.mrb[59].mxu1  ;;  %1993 = vmatmul.mubr.bf16.gmra.mrb[52].mxu0 %v1293_v46  ;;  %v1268_v56 = vmax.f32 %v1172_v49, 0.0 }
 0x386   :  { %v1167_v55 = vadd.f32 %v2464_v20, %v1166_v54  ;;  %v1266_v58 = vmax.f32 %v1164_v51, 0.0 }
 0x387   :  { %v1269_v57 = vmax.f32 %v1175_v53, 0.0 }
 0x388   :  { %v1267_v59 = vmax.f32 %v1167_v55, 0.0 }
 0x389   :  { %v1295_v60 = vpack.c.bf16 %v1269_v57, %v1268_v56 }
 0x38a   :  { %v1294_v61 = vpack.c.bf16 %v1267_v59, %v1266_v58  ;;  %v1954_v62 = vpop.f32.mrb[60].mxu1 }
 0x38b   :  { %v1188_v63 = vadd.f32 %v1954_v62, %v2464_v20  ;;  %v1179_v0 = vpop.f32.mrb[61].mxu1 }
 0x38c   :  { %v1180_v1 = vadd.f32 %v2464_v20, %v1179_v0  ;;  %v1955_v2 = vpop.f32.mrb[62].mxu1  ;;  %1996 = vmatprep.mubr.bf16.mxu0 %v1294_v61 }
 0x38d   :  { %v1191_v3 = vadd.f32 %v1955_v2, %v2464_v20  ;;  %v1182_v4 = vpop.f32.mrb[63].mxu1  ;;  %1997 = vmatmul.mubr.bf16.gmra.mrb[56].mxu0 %v1295_v60  ;;  %v1272_v6 = vmax.f32 %v1188_v63, 0.0 }
 0x38e   :  { %v1183_v5 = vadd.f32 %v2464_v20, %v1182_v4  ;;  %v1270_v9 = vmax.f32 %v1180_v1, 0.0 }
 0x38f   :  { %v1273_v8 = vmax.f32 %v1191_v3, 0.0 }
 0x390   :  { %v1271_v10 = vmax.f32 %v1183_v5, 0.0 }
 0x391   :  { %v1297_v11 = vpack.c.bf16 %v1273_v8, %v1272_v6 }
 0x392   :  { %v1296_v12 = vpack.c.bf16 %v1271_v10, %v1270_v9  ;;  %v1958_v13 = vpop.f32.mrb[64].mxu1  ;;  %v2501_v10 = vld [vmem:[%s2548_s10] ss:$0 sm:$0xff] }
 0x393   :  { %v1204_v14 = vadd.f32 %v1958_v13, %v2464_v20  ;;  %v1195_v15 = vpop.f32.mrb[65].mxu1 }
 0x394   :  { %v1196_v16 = vadd.f32 %v2464_v20, %v1195_v15  ;;  %v1959_v17 = vpop.f32.mrb[66].mxu1  ;;  %2000 = vmatprep.mubr.bf16.mxu0 %v1296_v12 }
 0x395   :  { %v1207_v18 = vadd.f32 %v1959_v17, %v2464_v20  ;;  %v1198_v19 = vpop.f32.mrb[67].mxu1  ;;  %2001 = vmatmul.mubr.bf16.gmra.mrb[60].mxu0 %v1297_v11  ;;  %v1276_v22 = vmax.f32 %v1204_v14, 0.0 }
 0x396   :  { %v1199_v21 = vadd.f32 %v2464_v20, %v1198_v19  ;;  %v1274_v24 = vmax.f32 %v1196_v16, 0.0 }
 0x397   :  { %v1277_v23 = vmax.f32 %v1207_v18, 0.0 }
 0x398   :  { %v1275_v25 = vmax.f32 %v1199_v21, 0.0 }
 0x399   :  { %v1299_v26 = vpack.c.bf16 %v1277_v23, %v1276_v22 }
 0x39a   :  { %v1298_v27 = vpack.c.bf16 %v1275_v25, %v1274_v24  ;;  %v1962_v37 = vpop.f32.mrb[68].mxu1 }
 0x39b   :  { %v1220_v28 = vadd.f32 %v1962_v37, %v2464_v20  ;;  %v1211_v29 = vpop.f32.mrb[69].mxu1 }
 0x39c   :  { %v1212_v30 = vadd.f32 %v2464_v20, %v1211_v29  ;;  %v1963_v43 = vpop.f32.mrb[70].mxu1  ;;  %2004 = vmatprep.mubr.bf16.mxu0 %v1298_v27 }
 0x39d   :  { %v1223_v7 = vadd.f32 %v1963_v43, %v2464_v20  ;;  %v1214_v31 = vpop.f32.mrb[71].mxu1  ;;  %2005 = vmatmul.mubr.bf16.gmra.mrb[64].mxu0 %v1299_v26  ;;  %v1280_v33 = vmax.f32 %v1220_v28, 0.0 }
 0x39e   :  { %v1215_v32 = vadd.f32 %v2464_v20, %v1214_v31  ;;  %v1278_v35 = vmax.f32 %v1212_v30, 0.0 }
 0x39f   :  { %v1281_v34 = vmax.f32 %v1223_v7, 0.0 }
 0x3a0   :  { %v1279_v36 = vmax.f32 %v1215_v32, 0.0 }
 0x3a1   :  { %v1301_v38 = vpack.c.bf16 %v1281_v34, %v1280_v33 }
 0x3a2   :  { %v1300_v39 = vpack.c.bf16 %v1279_v36, %v1278_v35  ;;  %v1966_v40 = vpop.f32.mrb[72].mxu1 }
 0x3a3   :  { %v1236_v41 = vadd.f32 %v1966_v40, %v2464_v20  ;;  %v1227_v42 = vpop.f32.mrb[73].mxu1 }
 0x3a4   :  { %v1228_v44 = vadd.f32 %v2464_v20, %v1227_v42  ;;  %v1967_v45 = vpop.f32.mrb[74].mxu1  ;;  %2008 = vmatprep.mubr.bf16.mxu0 %v1300_v39 }
 0x3a5   :  { %v1239_v46 = vadd.f32 %v1967_v45, %v2464_v20  ;;  %v1230_v47 = vpop.f32.mrb[75].mxu1  ;;  %2009 = vmatmul.mubr.bf16.gmra.mrb[68].mxu0 %v1301_v38  ;;  %v1284_v49 = vmax.f32 %v1236_v41, 0.0 }
 0x3a6   :  { %v1231_v48 = vadd.f32 %v2464_v20, %v1230_v47  ;;  %v1282_v51 = vmax.f32 %v1228_v44, 0.0 }
 0x3a7   :  { %v1285_v50 = vmax.f32 %v1239_v46, 0.0 }
 0x3a8   :  { %v1283_v52 = vmax.f32 %v1231_v48, 0.0 }
 0x3a9   :  { %v1303_v53 = vpack.c.bf16 %v1285_v50, %v1284_v49 }
 0x3aa   :  { %v1302_v54 = vpack.c.bf16 %v1283_v52, %v1282_v51  ;;  %v1970_v55 = vpop.f32.mrb[76].mxu1 }
 0x3ab   :  { %v1252_v56 = vadd.f32 %v1970_v55, %v2464_v20  ;;  %v1243_v57 = vpop.f32.mrb[77].mxu1 }
 0x3ac   :  { %v1244_v58 = vadd.f32 %v2464_v20, %v1243_v57  ;;  %v1971_v59 = vpop.f32.mrb[78].mxu1  ;;  %2012 = vmatprep.mubr.bf16.mxu0 %v1302_v54 }
 0x3ad   :  { %v1255_v60 = vadd.f32 %v1971_v59, %v2464_v20  ;;  %v1246_v61 = vpop.f32.mrb[79].mxu1  ;;  %2013 = vmatmul.mubr.bf16.gmra.mrb[72].mxu0 %v1303_v53  ;;  %v1288_v63 = vmax.f32 %v1252_v56, 0.0 }
 0x3ae   :  { %v1247_v62 = vadd.f32 %v2464_v20, %v1246_v61  ;;  %v1286_v1 = vmax.f32 %v1244_v58, 0.0 }
 0x3af   :  { %v1289_v0 = vmax.f32 %v1255_v60, 0.0 }
 0x3b0   :  { %v1287_v2 = vmax.f32 %v1247_v62, 0.0 }
 0x3b1   :  { %v1305_v3 = vpack.c.bf16 %v1289_v0, %v1288_v63 }
 0x3b2   :  { %v1304_v4 = vpack.c.bf16 %v1287_v2, %v1286_v1 }
 0x3b4   :  { %2016 = vmatprep.mubr.bf16.mxu0 %v1304_v4 }
 0x3b5   :  { %2017 = vmatmul.mubr.bf16.gmra.mrb[76].mxu0 %v1305_v3 }
 0x450   :  { %v1990_v5 = vpop.f32.mrb[48].mxu0 }
 0x451   :  { %v1411_v6 = vpop.f32.mrb[49].mxu0  ;;  %v1420_v20 = vadd.f32 %v1990_v5, %v2501_v10 }
 0x452   :  { %v1991_v8 = vpop.f32.mrb[50].mxu0  ;;  %v1412_v14 = vadd.f32 %v2501_v10, %v1411_v6 }
 0x453   :  { %v1414_v9 = vpop.f32.mrb[51].mxu0  ;;  %v1423_v17 = vadd.f32 %v1991_v8, %v2501_v10 }
 0x454   :  { %v1415_v22 = vadd.f32 %v2501_v10, %v1414_v9 }
 0x458   :  { %v1994_v11 = vpop.f32.mrb[52].mxu0 }
 0x459   :  { %v1436_v12 = vadd.f32 %v1994_v11, %v2501_v10  ;;  %v1427_v13 = vpop.f32.mrb[53].mxu0 }
 0x45a   :  { %v1428_v15 = vadd.f32 %v2501_v10, %v1427_v13  ;;  %v1995_v16 = vpop.f32.mrb[54].mxu0 }
 0x45b   :  { %v1540_v18 = vmax.f32 %v1420_v20, %v1436_v12  ;;  %v1439_v19 = vadd.f32 %v1995_v16, %v2501_v10  ;;  %v1430_v21 = vpop.f32.mrb[55].mxu0 }
 0x45c   :  { %v1538_v23 = vmax.f32 %v1412_v14, %v1428_v15  ;;  %v1431_v24 = vadd.f32 %v2501_v10, %v1430_v21 }
 0x45d   :  { %v1541_v25 = vmax.f32 %v1423_v17, %v1439_v19 }
 0x45e   :  { %v1539_v26 = vmax.f32 %v1415_v22, %v1431_v24 }
 0x460   :  { %v1998_v27 = vpop.f32.mrb[56].mxu0 }
 0x461   :  { %v1452_v37 = vadd.f32 %v1998_v27, %v2501_v10  ;;  %v1443_v28 = vpop.f32.mrb[57].mxu0 }
 0x462   :  { %v1444_v29 = vadd.f32 %v2501_v10, %v1443_v28  ;;  %v1999_v30 = vpop.f32.mrb[58].mxu0 }
 0x463   :  { %v1544_v43 = vmax.f32 %v1540_v18, %v1452_v37  ;;  %v1455_v7 = vadd.f32 %v1999_v30, %v2501_v10  ;;  %v1446_v31 = vpop.f32.mrb[59].mxu0 }
 0x464   :  { %v1542_v32 = vmax.f32 %v1538_v23, %v1444_v29  ;;  %v1447_v33 = vadd.f32 %v2501_v10, %v1446_v31 }
 0x465   :  { %v1545_v34 = vmax.f32 %v1541_v25, %v1455_v7 }
 0x466   :  { %v1543_v35 = vmax.f32 %v1539_v26, %v1447_v33 }
 0x468   :  { %v2002_v36 = vpop.f32.mrb[60].mxu0 }
 0x469   :  { %v1468_v38 = vadd.f32 %v2002_v36, %v2501_v10  ;;  %v1459_v39 = vpop.f32.mrb[61].mxu0 }
 0x46a   :  { %v1460_v40 = vadd.f32 %v2501_v10, %v1459_v39  ;;  %v2003_v41 = vpop.f32.mrb[62].mxu0 }
 0x46b   :  { %v1548_v42 = vmax.f32 %v1544_v43, %v1468_v38  ;;  %v1471_v44 = vadd.f32 %v2003_v41, %v2501_v10  ;;  %v1462_v45 = vpop.f32.mrb[63].mxu0 }
 0x46c   :  { %v1546_v46 = vmax.f32 %v1542_v32, %v1460_v40  ;;  %v1463_v47 = vadd.f32 %v2501_v10, %v1462_v45 }
 0x46d   :  { %v1549_v48 = vmax.f32 %v1545_v34, %v1471_v44 }
 0x46e   :  { %v1547_v49 = vmax.f32 %v1543_v35, %v1463_v47 }
 0x470   :  { %v2006_v50 = vpop.f32.mrb[64].mxu0 }
 0x471   :  { %v1484_v51 = vadd.f32 %v2006_v50, %v2501_v10  ;;  %v1475_v52 = vpop.f32.mrb[65].mxu0 }
 0x472   :  { %v1476_v53 = vadd.f32 %v2501_v10, %v1475_v52  ;;  %v2007_v54 = vpop.f32.mrb[66].mxu0 }
 0x473   :  { %v1552_v55 = vmax.f32 %v1548_v42, %v1484_v51  ;;  %v1487_v56 = vadd.f32 %v2007_v54, %v2501_v10  ;;  %v1478_v57 = vpop.f32.mrb[67].mxu0 }
 0x474   :  { %v1550_v58 = vmax.f32 %v1546_v46, %v1476_v53  ;;  %v1479_v59 = vadd.f32 %v2501_v10, %v1478_v57 }
 0x475   :  { %v1553_v60 = vmax.f32 %v1549_v48, %v1487_v56 }
 0x476   :  { %v1551_v61 = vmax.f32 %v1547_v49, %v1479_v59 }
 0x478   :  { %v2010_v62 = vpop.f32.mrb[68].mxu0 }
 0x479   :  { %v1500_v63 = vadd.f32 %v2010_v62, %v2501_v10  ;;  %v1491_v0 = vpop.f32.mrb[69].mxu0 }
 0x47a   :  { %v1492_v1 = vadd.f32 %v2501_v10, %v1491_v0  ;;  %v2011_v2 = vpop.f32.mrb[70].mxu0 }
 0x47b   :  { %v1556_v3 = vmax.f32 %v1552_v55, %v1500_v63  ;;  %v1503_v4 = vadd.f32 %v2011_v2, %v2501_v10  ;;  %v1494_v5 = vpop.f32.mrb[71].mxu0 }
 0x47c   :  { %v1554_v6 = vmax.f32 %v1550_v58, %v1492_v1  ;;  %v1495_v8 = vadd.f32 %v2501_v10, %v1494_v5 }
 0x47d   :  { %v1557_v9 = vmax.f32 %v1553_v60, %v1503_v4 }
 0x47e   :  { %v1555_v11 = vmax.f32 %v1551_v61, %v1495_v8 }
 0x480   :  { %v2014_v20 = vpop.f32.mrb[72].mxu0 }
 0x481   :  { %v1516_v12 = vadd.f32 %v2014_v20, %v2501_v10  ;;  %v1507_v13 = vpop.f32.mrb[73].mxu0 }
 0x482   :  { %v1508_v14 = vadd.f32 %v2501_v10, %v1507_v13  ;;  %v2015_v15 = vpop.f32.mrb[74].mxu0 }
 0x483   :  { %v1560_v16 = vmax.f32 %v1556_v3, %v1516_v12  ;;  %v1519_v17 = vadd.f32 %v2015_v15, %v2501_v10  ;;  %v1510_v18 = vpop.f32.mrb[75].mxu0 }
 0x484   :  { %v1558_v19 = vmax.f32 %v1554_v6, %v1508_v14  ;;  %v1511_v21 = vadd.f32 %v2501_v10, %v1510_v18 }
 0x485   :  { %v1561_v22 = vmax.f32 %v1557_v9, %v1519_v17 }
 0x486   :  { %v1559_v23 = vmax.f32 %v1555_v11, %v1511_v21 }
 0x488   :  { %v2018_v24 = vpop.f32.mrb[76].mxu0 }
 0x489   :  { %v1532_v25 = vadd.f32 %v2018_v24, %v2501_v10  ;;  %v1523_v26 = vpop.f32.mrb[77].mxu0 }
 0x48a   :  { %v1524_v27 = vadd.f32 %v2501_v10, %v1523_v26  ;;  %v2019_v37 = vpop.f32.mrb[78].mxu0 }
 0x48b   :  { %v1564_v28 = vmax.f32 %v1560_v16, %v1532_v25  ;;  %v1535_v29 = vadd.f32 %v2019_v37, %v2501_v10  ;;  %v1526_v30 = vpop.f32.mrb[79].mxu0 }
 0x48c   :  { %v1562_v43 = vmax.f32 %v1558_v19, %v1524_v27  ;;  %v1527_v7 = vadd.f32 %v2501_v10, %v1526_v30 }
 0x48d   :  { %v1565_v31 = vmax.f32 %v1561_v22, %v1535_v29 }
 0x48e   :  { %v1563_v32 = vmax.f32 %v1559_v23, %v1527_v7 }
 0x48f   :  { %v1567_v33 = vmax.f32 %v1564_v28, %v1565_v31 }
 0x490   :  { %v1566_v34 = vmax.f32 %v1562_v43, %v1563_v32 }
 0x492   :  { %v1568_v35 = vmax.f32 %v1566_v34, %v1567_v33 }
 0x494   :  { %v1569_v36 = vrot.slane %v1568_v35, 4 }
 0x496   :  { %v1570_v38 = vmax.f32 %v1568_v35, %v1569_v36 }
 0x498   :  { %v1571_v39 = vrot.slane %v1570_v38, 2 }
 0x49a   :  { %v1572_v40 = vmax.f32 %v1570_v38, %v1571_v39 }
 0x49c   :  { %v1573_v41 = vrot.slane %v1572_v40, 1 }
 0x49e   :  { %v1574_v42 = vmax.f32 %v1572_v40, %v1573_v41 }
 0x4a0   :  { %1575 = vst [vmem:[%s2549_s11] sm:$0x1] %v1574_v42 }

</bundles_post_ra>
